<compile_context>
chip_gen: v7x
topology: tpu7x:2x2x1
jax: 0.10.0
libtpu: 0.0.40
codegen_flags: <defaults>
</compile_context>

<pallas_src>
import jax
import jax.numpy as jnp
from jax import lax
from jax.experimental import pallas as pl
from jax.experimental.pallas import tpu as pltpu


def _affine_kernel(a_ref, b_ref, bias_ref, o_ref):
    # o = a @ b.T + bias   (contract the last dim of both operands on the MXU)
    #   grouped path   : a = X-group tile (tmg, g*D), b = kron(I_g, W) (g*d, g*D),
    #                    bias (1, g*d)  -> o (tmg, g*d)   [g*d = 128 lanes, dense]
    #   transposed path: a = W (d, D),   b = X tile (tm, D), bias (d, 1)
    #                    -> o (d, tm)                      [tm lanes, dense]
    acc = lax.dot_general(
        a_ref[...],
        b_ref[...],
        dimension_numbers=(((1,), (1,)), ((), ())),
        preferred_element_type=jnp.float32,
    )
    o_ref[...] = (acc + bias_ref[...]).astype(o_ref.dtype)


def _cdiv(a: int, b: int) -> int:
    return -(-a // b)


def _round_up(x: int, m: int) -> int:
    return _cdiv(x, m) * m


def _vmem_budget_bytes() -> int:
    # ~75% of physical VMEM: headroom for compiler-internal scratch.
    # v5e/v6e (128 MiB) -> ~96 MiB, v7x (64 MiB) -> ~48 MiB.
    try:
        cap = int(getattr(pltpu.get_tpu_info(), "vmem_capacity_bytes", 64 << 20))
    except Exception:
        cap = 64 << 20  # v7x-safe floor
    return cap * 3 // 4


def _pick_tile_rows(rows, in_row_bytes, out_row_bytes, resident_bytes, align,
                    target_bytes, vmem_budget):
    """Tile rows sized by bytes, capped by VMEM budget and by >=2 grid steps."""
    t = max(align, (target_bytes // max(in_row_bytes, 1)) // align * align)
    # Double-buffered input + output tiles must fit next to the resident operands.
    per_row = 2 * (in_row_bytes + out_row_bytes)
    avail = max(vmem_budget - resident_bytes - (2 << 20), per_row * align)
    t = min(t, max(align, (avail // per_row) // align * align))
    # Keep >= 2 grid steps where possible so v7x's two TCs both get work.
    t = min(t, _round_up(_cdiv(rows, 2), align))
    if t >= rows:
        return rows, 1  # single whole-array block (block dims == full dims)
    return t, _cdiv(rows, t)


def ridge_forward(X, W, b, *, target_tile_bytes: int = 4 << 20,
                  use_bf16: bool = False, out_dtype=None) -> jax.Array:
    """X: (N, D), W: (d, D), b: (1, d)  ->  (N, d)."""
    X = jnp.asarray(X)
    W = jnp.asarray(W)
    N, D = X.shape
    d = W.shape[0]
    b2 = jnp.asarray(b).reshape(1, d).astype(jnp.float32)

    in_dtype = jnp.bfloat16 if use_bf16 else X.dtype
    out_dtype = jnp.dtype(out_dtype) if out_dtype is not None else jnp.dtype(X.dtype)
    itemsize = jnp.dtype(in_dtype).itemsize
    vmem_budget = _vmem_budget_bytes()

    Xk = X.astype(in_dtype)
    Wk = W.astype(in_dtype)

    # ---- lane-dense grouped layout: (N, d) row-major == (N//g, g*d) row-major
    if d <= 128 and 128 % d == 0:
        g = 128 // d
    elif d % 128 == 0:
        g = 1
    else:
        g = 0  # no clean 128-lane grouping for this d
    wbig_bytes = (g * d) * (g * D) * itemsize if g else 0
    dense_ok = (g > 0 and N > 0 and N % g == 0
                and wbig_bytes <= min(8 << 20, vmem_budget // 4))

    if dense_ok:
        Ng = N // g
        Xg = Xk.reshape(Ng, g * D)  # metadata-only reshape (row-major compatible)
        WbigT = Wk if g == 1 else jnp.kron(jnp.eye(g, dtype=in_dtype), Wk)  # (g*d, g*D)
        bias = jnp.tile(b2, (1, g))                                          # (1, g*d)
        resident = WbigT.size * itemsize + bias.size * 4
        in_row = g * D * itemsize
        out_row = g * d * out_dtype.itemsize
        tmg, steps = _pick_tile_rows(Ng, in_row, out_row, resident, 8,
                                     target_tile_bytes, vmem_budget)
        needed = resident + 2 * tmg * (in_row + out_row)
        vmem_limit = int(min(vmem_budget, max(2 * needed, 16 << 20)))

        out_g = pl.pallas_call(
            _affine_kernel,
            out_shape=jax.ShapeDtypeStruct((Ng, g * d), out_dtype),
            grid_spec=pltpu.PrefetchScalarGridSpec(
                num_scalar_prefetch=0,
                grid=(steps,),
                in_specs=[
                    # X group-rows tile, pipelined over the parallel row axis.
                    pl.BlockSpec((tmg, g * D), lambda i: (i, 0)),
                    # Block-diagonal weight + tiled bias: resident whole-array VMEM.
                    pl.BlockSpec(memory_space=pltpu.MemorySpace.VMEM),
                    pl.BlockSpec(memory_space=pltpu.MemorySpace.VMEM),
                ],
                out_specs=pl.BlockSpec((tmg, g * d), lambda i: (i, 0)),
            ),
            compiler_params=pltpu.CompilerParams(
                dimension_semantics=("parallel",),
                vmem_limit_bytes=vmem_limit,
            ),
        )(Xg, WbigT, bias)
        # Byte-identical layout: reshape is metadata-only, no transpose pass.
        return out_g.reshape(N, d)

    # ---- fallback: transposed lane-dense output (d, N), ragged N handled by
    # Pallas edge-block masking (no jnp.pad of X). The wrapper transpose costs
    # one extra HBM round-trip of the *small* output only.
    bT = b2.T  # (d, 1)
    resident = Wk.size * itemsize + d * 4
    in_row = D * itemsize
    out_row = d * out_dtype.itemsize
    tm, steps = _pick_tile_rows(N, in_row, out_row, resident, 128,
                                target_tile_bytes, vmem_budget)
    needed = resident + 2 * tm * (in_row + out_row)
    vmem_limit = int(min(vmem_budget, max(2 * needed, 16 << 20)))

    outT = pl.pallas_call(
        _affine_kernel,
        out_shape=jax.ShapeDtypeStruct((d, N), out_dtype),
        grid_spec=pltpu.PrefetchScalarGridSpec(
            num_scalar_prefetch=0,
            grid=(steps,),
            in_specs=[
                pl.BlockSpec(memory_space=pltpu.MemorySpace.VMEM),   # W (d, D)
                pl.BlockSpec((tm, D), lambda i: (i, 0)),             # X row tile
                pl.BlockSpec(memory_space=pltpu.MemorySpace.VMEM),   # bias (d, 1)
            ],
            out_specs=pl.BlockSpec((d, tm), lambda i: (0, i)),
        ),
        compiler_params=pltpu.CompilerParams(
            dimension_semantics=("parallel",),
            vmem_limit_bytes=vmem_limit,
        ),
    )(Wk, Xk, bT)
    return outT.T


if __name__ == "__main__":
    # Shapes consistent with the module: N samples, D input features, d targets.
    N, D, d = 16, 32, 8

    key = jax.random.PRNGKey(0)
    kx, kw, kb = jax.random.split(key, 3)
    X = jax.random.normal(kx, (N, D), dtype=jnp.float32)
    # Deterministic "fitted" parameters (nn.Linear(D, d, bias=False).weight and
    # b = y_mean - X_mean @ W.T, shape (1, d)).
    W = jax.random.normal(kw, (d, D), dtype=jnp.float32) * 0.1
    b = jax.random.normal(kb, (1, d), dtype=jnp.float32) * 0.05

    # 1) N divisible by g = 128//d -> grouped lane-dense path, no transpose.
    out = jax.block_until_ready(ridge_forward(X, W, b))
    ref = X @ W.T + b
    assert out.shape == (N, d)
    assert jnp.allclose(out, ref, atol=1e-5, rtol=1e-5), "mismatch (grouped path)"

    # 2) Ragged N -> transposed fallback, 2-step grid with masked edge block.
    N2 = 300
    X2 = jax.random.normal(jax.random.PRNGKey(1), (N2, D), dtype=jnp.float32)
    out2 = jax.block_until_ready(ridge_forward(X2, W, b))
    ref2 = X2 @ W.T + b
    assert out2.shape == (N2, d)
    assert jnp.allclose(out2, ref2, atol=1e-5, rtol=1e-5), "mismatch (ragged path)"

    # 3) Larger divisible N -> multi-step grid on the grouped path.
    N3 = 512
    X3 = jax.random.normal(jax.random.PRNGKey(2), (N3, D), dtype=jnp.float32)
    out3 = jax.block_until_ready(ridge_forward(X3, W, b))
    ref3 = X3 @ W.T + b
    assert out3.shape == (N3, d)
    assert jnp.allclose(out3, ref3, atol=1e-5, rtol=1e-5), "mismatch (multi-block)"

    print("KERNEL_OK")
</pallas_src>

<mosaic_0001>
module attributes {stable_mosaic.version = 11 : i64} {
  func.func @_affine_kernel(%arg0: i32, %arg1: memref<1x512xf32, #tpu.memory_space<vmem>>, %arg2: memref<128x512xf32, #tpu.memory_space<vmem>>, %arg3: memref<1x128xf32, #tpu.memory_space<vmem>>, %arg4: memref<1x128xf32, #tpu.memory_space<vmem>>) attributes {dimension_semantics = [#tpu.dimension_semantics<parallel>], iteration_bounds = array<i64: 1>, scalar_prefetch = 0 : i64, scratch_operands = 0 : i64, tpu.core_type = #tpu.core_type<tc>, window_params = [{transform_indices = @transform_0, window_bounds = array<i64: 1, 512>}, {pipeline_mode = #tpu.pipeline_mode<synchronous>, transform_indices = @transform_1, window_bounds = array<i64: 128, 512>}, {pipeline_mode = #tpu.pipeline_mode<synchronous>, transform_indices = @transform_2, window_bounds = array<i64: 1, 128>}, {transform_indices = @transform_3, window_bounds = array<i64: 1, 128>}]} {
    %c0 = arith.constant 0 : index
    %c0_0 = arith.constant 0 : index
    %0 = vector.load %arg1[%c0, %c0_0] : memref<1x512xf32, #tpu.memory_space<vmem>>, vector<1x512xf32>
    %c0_1 = arith.constant 0 : index
    %c0_2 = arith.constant 0 : index
    %1 = vector.load %arg2[%c0_1, %c0_2] : memref<128x512xf32, #tpu.memory_space<vmem>>, vector<128x512xf32>
    %cst = arith.constant dense<0.000000e+00> : vector<1x128xf32>
    %2 = tpu.matmul %0, %1, %cst {dimension_numbers = #tpu.dot_dimension_numbers<[1], [1], [0], [0], [0, 0, 1, 0], [], []>} : vector<1x512xf32>, vector<128x512xf32>, vector<1x128xf32> -> vector<1x128xf32>
    %c0_3 = arith.constant 0 : index
    %c0_4 = arith.constant 0 : index
    %3 = vector.load %arg3[%c0_3, %c0_4] : memref<1x128xf32, #tpu.memory_space<vmem>>, vector<1x128xf32>
    %4 = arith.addf %2, %3 : vector<1x128xf32>
    %c0_5 = arith.constant 0 : index
    %c0_6 = arith.constant 0 : index
    %5 = vector.load %arg4[%c0_5, %c0_6] : memref<1x128xf32, #tpu.memory_space<vmem>>, vector<1x128xf32>
    tpu.vector_store %arg4[%c0_5, %c0_6], %4 {strides = array<i32>} : memref<1x128xf32, #tpu.memory_space<vmem>>, vector<1x128xf32>,
    return
  }
  func.func @transform_0(%arg0: i32) -> (i32, i32) {
    %c0_i32 = arith.constant 0 : i32
    %c0_i32_0 = arith.constant 0 : i32
    return %arg0, %c0_i32 : i32, i32
  }
  func.func @transform_1(%arg0: i32) -> (i32, i32) {
    %c0_i32 = arith.constant 0 : i32
    %c0_i32_0 = arith.constant 0 : i32
    %c0_i32_1 = arith.constant 0 : i32
    return %c0_i32, %c0_i32_0 : i32, i32
  }
  func.func @transform_2(%arg0: i32) -> (i32, i32) {
    %c0_i32 = arith.constant 0 : i32
    %c0_i32_0 = arith.constant 0 : i32
    %c0_i32_1 = arith.constant 0 : i32
    return %c0_i32, %c0_i32_0 : i32, i32
  }
  func.func @transform_3(%arg0: i32) -> (i32, i32) {
    %c0_i32 = arith.constant 0 : i32
    %c0_i32_0 = arith.constant 0 : i32
    return %arg0, %c0_i32 : i32, i32
  }
}

</mosaic_0001>

<bundles_post_ra>
// kernel: tpu_custom_call.1
= control target key start
LH: loop header
LB: loop body
LE: loop exit
PB: predicated region body
PF: predicated region fallthrough
CT: control target
= control target key end

     0   :  { %8 = vsyncpa [#allocation3], 0  ;;  %s511_s0 = inlined_call_operand.hbm [shape: f32[1,512], index: 0, kind: input, shape index: {}]   ;;  %s512_s1 = inlined_call_operand.hbm [shape: f32[128,512], index: 1, kind: input, shape index: {}]   ;;  %s513_s2 = inlined_call_operand.vmem [shape: f32[1,128], index: 2, kind: input, shape index: {}]   ;;  %s514_s3 = inlined_call_operand.hbm [shape: f32[1,128], index: 3, kind: output, shape index: {}]  }
   0x1   :  { %9 = vsyncpa [#allocation6], 0 }
   0x2   :  { %10 = vsyncpa [#allocation4], 0  ;;  %s428_s12 = smov [#allocation2]   ;;  %s429_s14 = smov [#allocation5]  }
   0x3   :  { %s17_s13 = sshll.u32 %s428_s12, 4  ;;  %s26_s15 = sshll.u32 %s429_s14, 4  ;;  %s18_s13 = int_to_ptr.vmem [resolvable:$true] %s17_s13  ;;  %s453_s15 = int_to_ptr.vmem [resolvable:$true] %s26_s15 }
   0x4   :  { %s356_s18 = scalar_lea.hbm %s511_s0, 64 }
   0x5   :  { %p357_p0 = scmp.ne.s32.totalorder %s511_s0, %s356_s18  ;;  %p360_p1 = scmp.lt.u32.totalorder %s356_s18, %s511_s0 }
   0x7   :  { %p362_p2 = pnand %p360_p1, %p357_p0 }
   0x9   :  { %365 = shalt.err (!%p362_p2)
}
   0xa   :  { %s366_s23 = scalar_lea.vmem %s18_s13, 64  ;;  %p371_p4 = scmp.lt.s32.totalorder %s18_s13, %s18_s13 }
   0xb   :  { %p367_p3 = scmp.ne.s32.totalorder %s18_s13, %s366_s23  ;;  %p372_p5 = scmp.lt.s32.totalorder %s366_s23, %s366_s23 }
   0xd   :  { %p373_p6 = por %p372_p5, %p371_p4 }
   0xf   :  { %p374_p7 = pnand %p373_p6, %p367_p3 }
  0x11   :  { %377 = shalt.err (!%p374_p7)
}
  0x12   :  { %20 = dma.hbm_to_vmem [thread:$0]  %s511_s0, 64, %s18_s13, [#allocation3]  }
  0x13   :  { %s378_s28 = scalar_lea.hbm %s512_s1, 8192 }
  0x14   :  { %p379_p8 = scmp.ne.s32.totalorder %s512_s1, %s378_s28  ;;  %p382_p9 = scmp.lt.u32.totalorder %s378_s28, %s512_s1 }
  0x16   :  { %p384_p10 = pnand %p382_p9, %p379_p8 }
  0x18   :  { %387 = shalt.err (!%p384_p10)
}
  0x19   :  { %s388_s6 = scalar_lea.vmem %s453_s15, 8192  ;;  %p393_p12 = scmp.lt.s32.totalorder %s453_s15, %s453_s15 }
  0x1a   :  { %p389_p11 = scmp.ne.s32.totalorder %s453_s15, %s388_s6  ;;  %p394_p13 = scmp.lt.s32.totalorder %s388_s6, %s388_s6 }
  0x1c   :  { %p395_p0 = por %p394_p13, %p393_p12 }
  0x1e   :  { %p396_p1 = pnand %p395_p0, %p389_p11 }
  0x20   :  { %399 = shalt.err (!%p396_p1)
}
  0x21   :  { %s430_s0 = smov 512   ;;  %s431_s7 = smov 32  }
  0x22   :  { %32 = dma.hbm_to_vmem [thread:$0]  %s512_s1, 8192, %s453_s15, [#allocation6], %s430_s0, %s430_s0, %s431_s7  }
  0x23   :  { %422 = dma.done.wait [#allocation3], 64  }
  0x24   :  { %423 = vsyncadd [#allocation3], 4294967232 }
  0x25   :  { %424 = dma.done.wait [#allocation6], 8192  }
  0x26   :  { %425 = vsyncadd [#allocation6], 4294959104  ;;  %v43_v0 = vld [vmem:[#allocation5 + $0x8] sm:$0xff]  ;;  %v42_v2 = vld [vmem:[#allocation5] sm:$0xff]  ;;  %v108_v30 = vlaneseq  ;;  %s432_s11 = smov [#allocation7]  }
  0x27   :  { %v47_v1 = vld [vmem:[#allocation5 + $0x28] sm:$0xff]  ;;  %v46_v4 = vld [vmem:[#allocation5 + $0x20] sm:$0xff]  ;;  %v45_v5 = vld [vmem:[#allocation5 + $0x18] sm:$0xff]  ;;  %s275_s12 = sshll.u32 %s432_s11, 4  ;;  %s276_s12 = int_to_ptr.vmem [resolvable:$true] %s275_s12 }
  0x28   :  { %v285_v3 = vpack.c.bf16 %v47_v1, %v43_v0  ;;  %v49_v6 = vld [vmem:[#allocation5 + $0x38] sm:$0xff]  ;;  %v287_v7 = vpack.c.bf16 %v46_v4, %v42_v2  ;;  %v44_v9 = vld [vmem:[#allocation5 + $0x10] sm:$0xff]  ;;  %v51_v11 = vld [vmem:[#allocation5 + $0x48] sm:$0xff]  ;;  %v484_v37 = vshrl.u32 %v108_v30, 7  ;;  %s400_s13 = scalar_lea.vmem %s276_s12, 16  ;;  %s404_s14 = scalar_lea.vmem %s276_s12, 32 }
  0x29   :  { %v317_v8 = vpack.c.bf16 %v49_v6, %v45_v5  ;;  %v48_v10 = vld [vmem:[#allocation5 + $0x30] sm:$0xff]  ;;  %v55_v13 = vld [vmem:[#allocation5 + $0x68] sm:$0xff]  ;;  %v53_v15 = vld [vmem:[#allocation5 + $0x58] sm:$0xff]  ;;  %p401_p2 = scmp.ne.s32.totalorder %s276_s12, %s400_s13  ;;  %p405_p3 = scmp.lt.s32.totalorder %s276_s12, %s276_s12 }
  0x2a   :  { %286 = vmatprep.subr.bf16.mxu1 %v285_v3  ;;  %v319_v12 = vpack.c.bf16 %v48_v10, %v44_v9  ;;  %v289_v14 = vpack.c.bf16 %v55_v13, %v51_v11  ;;  %v57_v16 = vld [vmem:[#allocation5 + $0x78] sm:$0xff]  ;;  %v50_v17 = vld [vmem:[#allocation5 + $0x40] sm:$0xff]  ;;  %v52_v20 = vld [vmem:[#allocation5 + $0x50] sm:$0xff]  ;;  %v114_v44 = vsub.s32 1, %v484_v37  ;;  %v122_v45 = vsub.s32 3, %v484_v37  ;;  %p406_p4 = scmp.lt.s32.totalorder %s404_s14, %s400_s13 }
  0x2b   :  { %288 = vmatpush1.bf16.xpose.msra.mxu1 %v287_v7  ;;  %318 = vmatprep.subr.bf16.mxu0 %v317_v8  ;;  %v54_v18 = vld [vmem:[#allocation5 + $0x60] sm:$0xff]  ;;  %v321_v19 = vpack.c.bf16 %v57_v16, %v53_v15  ;;  %v56_v21 = vld [vmem:[#allocation5 + $0x70] sm:$0xff]  ;;  %v59_v22 = vld [vmem:[#allocation5 + $0x88] sm:$0xff] }
  0x2c   :  { %320 = vmatpush1.bf16.xpose.msra.mxu0 %v319_v12  ;;  %290 = vmatprep.subr.bf16.mxu1 %v289_v14  ;;  %v63_v23 = vld [vmem:[#allocation5 + $0xa8] sm:$0xff]  ;;  %v61_v24 = vld [vmem:[#allocation5 + $0x98] sm:$0xff]  ;;  %v291_v26 = vpack.c.bf16 %v54_v18, %v50_v17  ;;  %v323_v27 = vpack.c.bf16 %v56_v21, %v52_v20  ;;  %v58_v31 = vld [vmem:[#allocation5 + $0x80] sm:$0xff]  ;;  %p407_p5 = por %p406_p4, %p405_p3 }
  0x2d   :  { %322 = vmatprep.subr.bf16.mxu0 %v321_v19  ;;  %v65_v25 = vld [vmem:[#allocation5 + $0xb8] sm:$0xff]  ;;  %v293_v28 = vpack.c.bf16 %v63_v23, %v59_v22  ;;  %v62_v32 = vld [vmem:[#allocation5 + $0xa0] sm:$0xff]  ;;  %v60_v33 = vld [vmem:[#allocation5 + $0x90] sm:$0xff] }
  0x2e   :  { %v325_v29 = vpack.c.bf16 %v65_v25, %v61_v24  ;;  %v64_v34 = vld [vmem:[#allocation5 + $0xb0] sm:$0xff]  ;;  %v67_v35 = vld [vmem:[#allocation5 + $0xc8] sm:$0xff]  ;;  %v69_v38 = vld [vmem:[#allocation5 + $0xd8] sm:$0xff]  ;;  %v295_v40 = vpack.c.bf16 %v62_v32, %v58_v31  ;;  %p408_p6 = pnand %p407_p5, %p401_p2 }
  0x2f   :  { %v71_v36 = vld [vmem:[#allocation5 + $0xe8] sm:$0xff]  ;;  %v73_v39 = vld [vmem:[#allocation5 + $0xf8] sm:$0xff]  ;;  %v327_v41 = vpack.c.bf16 %v64_v34, %v60_v33  ;;  %v66_v46 = vld [vmem:[#allocation5 + $0xc0] sm:$0xff] }
  0x30   :  { %v297_v42 = vpack.c.bf16 %v71_v36, %v67_v35  ;;  %v329_v43 = vpack.c.bf16 %v73_v39, %v69_v38  ;;  %v70_v47 = vld [vmem:[#allocation5 + $0xe0] sm:$0xff]  ;;  %v68_v48 = vld [vmem:[#allocation5 + $0xd0] sm:$0xff]  ;;  %v488_v49 = vld [vmem:[#allocation2] sm:$0xf] }
  0x31   :  { %v72_v50 = vld [vmem:[#allocation5 + $0xf0] sm:$0xff]  ;;  %v75_v51 = vld [vmem:[#allocation5 + $0x108] sm:$0xff]  ;;  %v115_v53 = vrot.slane %v488_v49, %v114_v44  ;;  %v123_v54 = vrot.slane %v488_v49, %v122_v45  ;;  %v77_v55 = vld [vmem:[#allocation5 + $0x118] sm:$0xff]  ;;  %v299_v57 = vpack.c.bf16 %v70_v47, %v66_v46 }
  0x32   :  { %v79_v52 = vld [vmem:[#allocation5 + $0x128] sm:$0xff]  ;;  %v81_v56 = vld [vmem:[#allocation5 + $0x138] sm:$0xff]  ;;  %v331_v58 = vpack.c.bf16 %v72_v50, %v68_v48  ;;  %v74_v61 = vld [vmem:[#allocation5 + $0x100] sm:$0xff] }
  0x33   :  { %292 = vmatpush1.bf16.xpose.msra.mxu1 %v291_v26  ;;  %192 = vmatprep.mubr.f32.mxu1 %v115_v53  ;;  %v301_v59 = vpack.c.bf16 %v79_v52, %v75_v51  ;;  %v333_v60 = vpack.c.bf16 %v81_v56, %v77_v55  ;;  %v78_v62 = vld [vmem:[#allocation5 + $0x120] sm:$0xff]  ;;  %v76_v63 = vld [vmem:[#allocation5 + $0x110] sm:$0xff]  ;;  %v83_v1 = vld [vmem:[#allocation5 + $0x148] sm:$0xff] }
  0x34   :  { %324 = vmatpush1.bf16.xpose.msra.mxu0 %v323_v27  ;;  %294 = vmatprep.subr.bf16.mxu1 %v293_v28  ;;  %v80_v0 = vld [vmem:[#allocation5 + $0x130] sm:$0xff]  ;;  %v87_v2 = vld [vmem:[#allocation5 + $0x168] sm:$0xff]  ;;  %v85_v3 = vld [vmem:[#allocation5 + $0x158] sm:$0xff]  ;;  %v303_v5 = vpack.c.bf16 %v78_v62, %v74_v61 }
  0x35   :  { %326 = vmatprep.subr.bf16.mxu0 %v325_v29  ;;  %262 = vmatprep.mubr.f32.mxu0 %v123_v54  ;;  %v89_v4 = vld [vmem:[#allocation5 + $0x178] sm:$0xff]  ;;  %v335_v6 = vpack.c.bf16 %v80_v0, %v76_v63  ;;  %v305_v7 = vpack.c.bf16 %v87_v2, %v83_v1  ;;  %v82_v9 = vld [vmem:[#allocation5 + $0x140] sm:$0xff]  ;;  %v84_v11 = vld [vmem:[#allocation5 + $0x150] sm:$0xff] }
  0x36   :  { %v337_v8 = vpack.c.bf16 %v89_v4, %v85_v3  ;;  %v86_v10 = vld [vmem:[#allocation5 + $0x160] sm:$0xff]  ;;  %v88_v12 = vld [vmem:[#allocation5 + $0x170] sm:$0xff]  ;;  %v91_v13 = vld [vmem:[#allocation5 + $0x188] sm:$0xff] }
  0x37   :  { %v95_v14 = vld [vmem:[#allocation5 + $0x1a8] sm:$0xff]  ;;  %v93_v15 = vld [vmem:[#allocation5 + $0x198] sm:$0xff]  ;;  %v307_v17 = vpack.c.bf16 %v86_v10, %v82_v9  ;;  %v339_v18 = vpack.c.bf16 %v88_v12, %v84_v11  ;;  %v90_v21 = vld [vmem:[#allocation5 + $0x180] sm:$0xff] }
  0x38   :  { %v97_v16 = vld [vmem:[#allocation5 + $0x1b8] sm:$0xff]  ;;  %v309_v19 = vpack.c.bf16 %v95_v14, %v91_v13  ;;  %v94_v22 = vld [vmem:[#allocation5 + $0x1a0] sm:$0xff]  ;;  %v92_v23 = vld [vmem:[#allocation5 + $0x190] sm:$0xff] }
  0x39   :  { %v341_v20 = vpack.c.bf16 %v97_v16, %v93_v15  ;;  %v96_v24 = vld [vmem:[#allocation5 + $0x1b0] sm:$0xff]  ;;  %v99_v25 = vld [vmem:[#allocation5 + $0x1c8] sm:$0xff]  ;;  %v101_v27 = vld [vmem:[#allocation5 + $0x1d8] sm:$0xff]  ;;  %v311_v29 = vpack.c.bf16 %v94_v22, %v90_v21 }
  0x3a   :  { %v103_v26 = vld [vmem:[#allocation5 + $0x1e8] sm:$0xff]  ;;  %v105_v28 = vld [vmem:[#allocation5 + $0x1f8] sm:$0xff]  ;;  %v343_v30 = vpack.c.bf16 %v96_v24, %v92_v23  ;;  %v98_v33 = vld [vmem:[#allocation5 + $0x1c0] sm:$0xff] }
  0x3b   :  { %296 = vmatpush1.bf16.xpose.msra.mxu1 %v295_v40  ;;  %v313_v31 = vpack.c.bf16 %v103_v26, %v99_v25  ;;  %v345_v32 = vpack.c.bf16 %v105_v28, %v101_v27  ;;  %v102_v34 = vld [vmem:[#allocation5 + $0x1e0] sm:$0xff]  ;;  %v100_v35 = vld [vmem:[#allocation5 + $0x1d0] sm:$0xff]  ;;  %v110_v40 = vsub.s32 0, %v484_v37  ;;  %v106_v44 = vld [vmem:[%s513_s2] sm:$0x1] }
  0x3c   :  { %328 = vmatpush1.bf16.xpose.msra.mxu0 %v327_v41  ;;  %298 = vmatprep.subr.bf16.mxu1 %v297_v42  ;;  %v104_v36 = vld [vmem:[#allocation5 + $0x1f0] sm:$0xff]  ;;  %v315_v38 = vpack.c.bf16 %v102_v34, %v98_v33  ;;  %v118_v41 = vsub.s32 2, %v484_v37 }
  0x3d   :  { %330 = vmatprep.subr.bf16.mxu0 %v329_v43  ;;  %v347_v39 = vpack.c.bf16 %v104_v36, %v100_v35  ;;  %v111_v42 = vrot.slane %v488_v49, %v110_v40 }
  0x3e   :  { %v119_v43 = vrot.slane %v488_v49, %v118_v41 }
  0x43   :  { %300 = vmatpush1.bf16.xpose.msra.mxu1 %v299_v57 }
  0x44   :  { %332 = vmatpush1.bf16.xpose.msra.mxu0 %v331_v58  ;;  %302 = vmatprep.subr.bf16.mxu1 %v301_v59 }
  0x45   :  { %334 = vmatprep.subr.bf16.mxu0 %v333_v60 }
  0x4b   :  { %304 = vmatpush1.bf16.xpose.msra.mxu1 %v303_v5 }
  0x4c   :  { %336 = vmatpush1.bf16.xpose.msra.mxu0 %v335_v6  ;;  %306 = vmatprep.subr.bf16.mxu1 %v305_v7 }
  0x4d   :  { %338 = vmatprep.subr.bf16.mxu0 %v337_v8 }
  0x53   :  { %308 = vmatpush1.bf16.xpose.msra.mxu1 %v307_v17 }
  0x54   :  { %340 = vmatpush1.bf16.xpose.msra.mxu0 %v339_v18  ;;  %310 = vmatprep.subr.bf16.mxu1 %v309_v19 }
  0x55   :  { %342 = vmatprep.subr.bf16.mxu0 %v341_v20 }
  0x5b   :  { %312 = vmatpush1.bf16.xpose.msra.mxu1 %v311_v29 }
  0x5c   :  { %344 = vmatpush1.bf16.xpose.msra.mxu0 %v343_v30  ;;  %314 = vmatprep.subr.bf16.mxu1 %v313_v31 }
  0x5d   :  { %346 = vmatprep.subr.bf16.mxu0 %v345_v32 }
  0x63   :  { %316 = vmatpush1.bf16.xpose.msra.mxu1 %v315_v38 }
  0x64   :  { %348 = vmatpush1.bf16.xpose.msra.mxu0 %v347_v39 }
  0x6a   :  { %193 = vmatmul.mubr.f32.vlgmr.msra.gmra.mrb[0].mxu1 %v111_v42 }
  0x6b   :  { %263 = vmatmul.mubr.f32.vlgmr.msra.gmra.mrb[0].mxu0 %v119_v43 }
 0x13d   :  { %v194_v45 = vpop.f32.mrb[0].mxu1 }
 0x13e   :  { %v195_v46 = vadd.f32 %v194_v45, %v106_v44  ;;  %v196_v47 = vpop.f32.mrb[1].mxu1  ;;  %v264_v48 = vpop.f32.mrb[0].mxu0 }
 0x13f   :  { %v266_v50 = vpop.f32.mrb[1].mxu0 }
 0x140   :  { %v265_v51 = vadd.f32 %v264_v48, %v195_v46 }
 0x142   :  { %268 = vst [vmem:[#allocation7] sm:$0x1] %v265_v51 }
 0x143   :  { %411 = shalt.err (!%p408_p6)
}
 0x144   :  { %s412_s16 = scalar_lea.hbm %s514_s3, 16 }
 0x145   :  { %p413_p7 = scmp.ne.s32.totalorder %s514_s3, %s412_s16  ;;  %p416_p8 = scmp.lt.u32.totalorder %s412_s16, %s514_s3 }
 0x147   :  { %p418_p9 = pnand %p416_p8, %p413_p7 }
 0x149   :  { %421 = shalt.err (!%p418_p9)
}
 0x14a   :  { %278 = dma.vmem_to_hbm [thread:$0]  %s276_s12, 16, %s514_s3, [#allocation4]  }
 0x14b   :  { %426 = dma.done.wait [#allocation4], 16  }
 0x14c   :  { %427 = vsyncadd [#allocation4], 4294967280 }
 0x14d   :  { %282 = vsyncpa [#allocation3], 1 }
 0x14e   :  { %283 = vsyncpa [#allocation6], 1 }
 0x14f   :  { %284 = vsyncpa [#allocation4], 1 }

</bundles_post_ra>
